<compile_context>
chip_gen: v7x
topology: tpu7x:2x2x1
jax: 0.10.0
libtpu: 0.0.40
codegen_flags: <defaults>
</compile_context>

<pallas_src>
import functools

import jax
import jax.numpy as jnp
from jax.experimental import pallas as pl
from jax.experimental.pallas import tpu as pltpu


def _round_up(x: int, m: int) -> int:
    return (x + m - 1) // m * m


def _vmem_capacity_bytes() -> int:
    """Physical VMEM of the local TPU; conservative fallback = v7x (64 MiB)."""
    try:
        info = pltpu.get_tpu_info()
        cap = int(getattr(info, "vmem_capacity_bytes", 0) or 0)
        if cap > 0:
            return cap
    except Exception:
        pass
    return 64 * 2**20


def _decoder_mlp_kernel(x_ref, *refs, compute_dtype, pack):
    """Fused row-wise MLP over one tile of nodes; lane-dense packed output.

    refs = (w0, b0, w1, b1, ..., wL, bL, out_ref)
    """
    out_ref = refs[-1]
    params = refs[:-1]
    num_linear = len(params) // 2

    h = x_ref[...]
    for i in range(num_linear):
        w = params[2 * i][...]
        b = params[2 * i + 1][...]
        # MXU matmul (bf16 operands on the bf16 path), f32 accumulation.
        h = jnp.dot(h.astype(compute_dtype), w.astype(compute_dtype),
                    preferred_element_type=jnp.float32)
        h = h + b.astype(jnp.float32)
        if i < num_linear - 1:
            h = jnp.maximum(h, 0.0)                # ReLU (VPU, f32)

    h = h.astype(out_ref.dtype)                    # (tile, d_pad)
    if pack == 1:
        out_ref[...] = h
    else:
        # Chunk-pack `pack` groups of consecutive node rows into the 128 lanes
        # so the HBM writeback is lane-dense.  Only static sublane slices and a
        # lane-axis concat are used (robust Mosaic lowering, no reshape across
        # the lane dim).  Unpacked with a cheap reshape/transpose outside.
        tile = h.shape[0]
        rows = tile // pack
        pieces = [h[j * rows:(j + 1) * rows, :] for j in range(pack)]
        out_ref[...] = jnp.concatenate(pieces, axis=-1)   # (rows, pack*d_pad)


def graphnet_decoder(node_features, weights, biases, *, tile_nodes=None,
                     compute_dtype=None):
    """Apply the decoder MLP to node_features ([N, latent]) with Pallas.

    weights: list of [in_dim, out_dim] arrays
    biases:  list of [1, out_dim] arrays
    Output dtype follows node_features.dtype.  bf16 node features (or an
    explicit compute_dtype=jnp.bfloat16) enable the native bf16 MXU path;
    accumulation is f32 in all cases.
    """
    n_nodes, latent = node_features.shape
    out_dim = int(weights[-1].shape[1])

    if compute_dtype is None:
        compute_dtype = (jnp.bfloat16 if node_features.dtype == jnp.bfloat16
                         else jnp.float32)
    io_dtype = node_features.dtype
    io_bytes = jnp.dtype(io_dtype).itemsize

    # --- output packing geometry ------------------------------------------
    if out_dim >= 128:
        d_pad = _round_up(out_dim, 128)            # already lane-dense
        pack = 1
    else:
        d_pad = 1 << max(0, (out_dim - 1).bit_length())   # next pow2 divisor of 128
        pack = 128 // d_pad
    lanes = pack * d_pad                           # width of the packed slab

    # --- pad / cast parameters (tiny, stays resident in VMEM) -------------
    weights = [jnp.asarray(w) for w in weights]
    biases = [jnp.asarray(b) for b in biases]
    if d_pad != out_dim:
        weights[-1] = jnp.pad(weights[-1], ((0, 0), (0, d_pad - out_dim)))
        biases[-1] = jnp.pad(biases[-1], ((0, 0), (0, d_pad - out_dim)))
    weights = [w.astype(compute_dtype) for w in weights]
    biases = [b.astype(jnp.float32) for b in biases]
    param_bytes = sum(int(a.size) * jnp.dtype(a.dtype).itemsize
                      for a in (*weights, *biases))

    # --- tile selection: biggest tile that fits the VMEM budget -----------
    align = max(128, 8 * pack)                     # sublane + MXU friendly
    vmem_budget = int(0.70 * _vmem_capacity_bytes())
    per_row = (2 * latent * io_bytes               # input, double-buffered
               + 2 * d_pad * io_bytes              # packed output, double-buffered
               + 4 * max(latent, d_pad) * 4)       # f32 working values slack
    avail = max(vmem_budget - 2 * param_bytes - (4 << 20), per_row * align)
    tile_cap = max(align, min(8192, (avail // per_row) // align * align))
    if tile_nodes is None:
        tile_nodes = min(tile_cap, _round_up(n_nodes, align))
    tile_nodes = max(align, _round_up(tile_nodes, align))

    grid_n = pl.cdiv(n_nodes, tile_nodes)          # last block may be partial
    rows = tile_nodes // pack                      # packed rows per tile

    # --- specs -------------------------------------------------------------
    in_specs = [pl.BlockSpec((tile_nodes, latent), lambda i: (i, 0))]
    flat_params = []
    for w, b in zip(weights, biases):
        in_specs.append(pl.BlockSpec(w.shape, lambda i: (0, 0)))
        in_specs.append(pl.BlockSpec(b.shape, lambda i: (0, 0)))
        flat_params.extend([w, b])
    out_spec = pl.BlockSpec((rows, lanes), lambda i: (i, 0))

    # --- cost estimate & VMEM budget ----------------------------------------
    flops = 2 * grid_n * tile_nodes * sum(int(w.shape[0]) * int(w.shape[1])
                                          for w in weights)
    bytes_accessed = (n_nodes * latent * io_bytes
                      + grid_n * rows * lanes * io_bytes
                      + param_bytes)
    need = (2 * tile_nodes * latent * io_bytes
            + 2 * rows * lanes * io_bytes
            + 2 * param_bytes
            + 4 * tile_nodes * max(latent, d_pad) * 4)
    vmem_limit = int(min(vmem_budget, max(16 * 2**20, 2 * need)))

    out_packed = pl.pallas_call(
        functools.partial(_decoder_mlp_kernel,
                          compute_dtype=compute_dtype, pack=pack),
        out_shape=jax.ShapeDtypeStruct((grid_n * rows, lanes), io_dtype),
        grid_spec=pltpu.PrefetchScalarGridSpec(
            num_scalar_prefetch=0,
            grid=(grid_n,),
            in_specs=in_specs,
            out_specs=out_spec,
        ),
        compiler_params=pltpu.CompilerParams(
            dimension_semantics=("parallel",),
            vmem_limit_bytes=vmem_limit,
        ),
        cost_estimate=pl.CostEstimate(
            flops=int(flops), transcendentals=0,
            bytes_accessed=int(bytes_accessed),
        ),
    )(node_features, *flat_params)

    # --- unpack the tiny lane-dense slab back to (N, out_dim) --------------
    if pack == 1:
        out = out_packed
    else:
        out = out_packed.reshape(grid_n, rows, pack, d_pad)
        out = jnp.transpose(out, (0, 2, 1, 3)).reshape(grid_n * tile_nodes, d_pad)
    return out[:n_nodes, :out_dim]


def init_decoder_params(key, latent_size, output_size, num_layers):
    """Deterministic init matching the PyTorch module's layer shapes."""
    widths = [latent_size] + [latent_size] * num_layers + [output_size]
    weights, biases = [], []
    for i in range(len(widths) - 1):
        fan_in, fan_out = widths[i], widths[i + 1]
        key, kw, kb = jax.random.split(key, 3)
        bound = 1.0 / jnp.sqrt(fan_in)
        # stored as [in, out] (transpose of torch Linear.weight)
        w = jax.random.uniform(kw, (fan_in, fan_out), jnp.float32, -bound, bound)
        b = jax.random.uniform(kb, (1, fan_out), jnp.float32, -bound, bound)
        weights.append(w)
        biases.append(b)
    return weights, biases


def reference_decoder(node_features, weights, biases, compute_dtype):
    h = node_features
    for i, (w, b) in enumerate(zip(weights, biases)):
        h = jnp.dot(h.astype(compute_dtype), w.astype(compute_dtype),
                    preferred_element_type=jnp.float32) + b.astype(jnp.float32)
        if i < len(weights) - 1:
            h = jnp.maximum(h, 0.0)
    return h.astype(node_features.dtype)


if __name__ == "__main__":
    # Small shapes consistent with the module's forward.
    latent_size = 32
    output_size = 8
    num_layers = 2
    n_nodes = 128

    key = jax.random.PRNGKey(0)
    key, k_nodes = jax.random.split(key)

    # MultiGraph: the decoder only consumes node_features; edge sets are ignored.
    node_features = jax.random.normal(k_nodes, (n_nodes, latent_size), jnp.float32)
    weights, biases = init_decoder_params(key, latent_size, output_size, num_layers)

    # f32 path (matches the PyTorch module's default dtype).
    out = jax.block_until_ready(graphnet_decoder(node_features, weights, biases))
    ref = reference_decoder(node_features, weights, biases, jnp.float32)
    assert out.shape == (n_nodes, output_size)
    assert jnp.allclose(out, ref, atol=1e-4, rtol=1e-4), "mismatch vs f32 reference"

    # Ragged node count: exercises the partial last block (no jnp.pad of input).
    n_ragged = 100
    x_ragged = node_features[:n_ragged]
    out_r = jax.block_until_ready(graphnet_decoder(x_ragged, weights, biases))
    ref_r = reference_decoder(x_ragged, weights, biases, jnp.float32)
    assert out_r.shape == (n_ragged, output_size)
    assert jnp.allclose(out_r, ref_r, atol=1e-4, rtol=1e-4), "mismatch (ragged N)"

    # bf16 I/O path: bf16 MXU operands, f32 accumulation (half the HBM traffic).
    x_bf16 = node_features.astype(jnp.bfloat16)
    out_bf16 = jax.block_until_ready(graphnet_decoder(x_bf16, weights, biases))
    ref_bf16 = reference_decoder(x_bf16, weights, biases, jnp.bfloat16)
    assert out_bf16.shape == (n_nodes, output_size)
    assert out_bf16.dtype == jnp.bfloat16
    assert bool(jnp.all(jnp.isfinite(out_bf16.astype(jnp.float32))))
    assert jnp.allclose(out_bf16.astype(jnp.float32), ref_bf16.astype(jnp.float32),
                        atol=2e-2, rtol=2e-2), "mismatch vs bf16 reference"

    print("KERNEL_OK")
</pallas_src>

<mosaic_0001>
module attributes {stable_mosaic.version = 11 : i64} {
  func.func @_decoder_mlp_kernel(%arg0: i32, %arg1: memref<128x32xf32, #tpu.memory_space<vmem>>, %arg2: memref<32x32xf32, #tpu.memory_space<vmem>>, %arg3: memref<1x32xf32, #tpu.memory_space<vmem>>, %arg4: memref<32x32xf32, #tpu.memory_space<vmem>>, %arg5: memref<1x32xf32, #tpu.memory_space<vmem>>, %arg6: memref<32x8xf32, #tpu.memory_space<vmem>>, %arg7: memref<1x8xf32, #tpu.memory_space<vmem>>, %arg8: memref<8x128xf32, #tpu.memory_space<vmem>>) attributes {dimension_semantics = [#tpu.dimension_semantics<parallel>], iteration_bounds = array<i64: 1>, scalar_prefetch = 0 : i64, scratch_operands = 0 : i64, tpu.core_type = #tpu.core_type<tc>, window_params = [{transform_indices = @transform_0, window_bounds = array<i64: 128, 32>}, {pipeline_mode = #tpu.pipeline_mode<synchronous>, transform_indices = @transform_1, window_bounds = array<i64: 32, 32>}, {pipeline_mode = #tpu.pipeline_mode<synchronous>, transform_indices = @transform_2, window_bounds = array<i64: 1, 32>}, {pipeline_mode = #tpu.pipeline_mode<synchronous>, transform_indices = @transform_3, window_bounds = array<i64: 32, 32>}, {pipeline_mode = #tpu.pipeline_mode<synchronous>, transform_indices = @transform_4, window_bounds = array<i64: 1, 32>}, {pipeline_mode = #tpu.pipeline_mode<synchronous>, transform_indices = @transform_5, window_bounds = array<i64: 32, 8>}, {pipeline_mode = #tpu.pipeline_mode<synchronous>, transform_indices = @transform_6, window_bounds = array<i64: 1, 8>}, {transform_indices = @transform_7, window_bounds = array<i64: 8, 128>}]} {
    %c0 = arith.constant 0 : index
    %c0_0 = arith.constant 0 : index
    %0 = vector.load %arg1[%c0, %c0_0] : memref<128x32xf32, #tpu.memory_space<vmem>>, vector<128x32xf32>
    %c0_1 = arith.constant 0 : index
    %c0_2 = arith.constant 0 : index
    %1 = vector.load %arg2[%c0_1, %c0_2] : memref<32x32xf32, #tpu.memory_space<vmem>>, vector<32x32xf32>
    %c0_3 = arith.constant 0 : index
    %c0_4 = arith.constant 0 : index
    %2 = vector.load %arg3[%c0_3, %c0_4] : memref<1x32xf32, #tpu.memory_space<vmem>>, vector<1x32xf32>
    %cst = arith.constant dense<0.000000e+00> : vector<128x32xf32>
    %3 = tpu.matmul %0, %1, %cst {dimension_numbers = #tpu.dot_dimension_numbers<[1], [0], [0], [1], [0, 0, 1, 1], [], []>} : vector<128x32xf32>, vector<32x32xf32>, vector<128x32xf32> -> vector<128x32xf32>
    %4 = vector.broadcast %2 : vector<1x32xf32> to vector<128x32xf32>
    %5 = arith.addf %3, %4 : vector<128x32xf32>
    %cst_5 = arith.constant 0.000000e+00 : f32
    %6 = vector.broadcast %cst_5 : f32 to vector<128x32xf32>
    %7 = arith.maximumf %5, %6 : vector<128x32xf32>
    %c0_6 = arith.constant 0 : index
    %c0_7 = arith.constant 0 : index
    %8 = vector.load %arg4[%c0_6, %c0_7] : memref<32x32xf32, #tpu.memory_space<vmem>>, vector<32x32xf32>
    %c0_8 = arith.constant 0 : index
    %c0_9 = arith.constant 0 : index
    %9 = vector.load %arg5[%c0_8, %c0_9] : memref<1x32xf32, #tpu.memory_space<vmem>>, vector<1x32xf32>
    %cst_10 = arith.constant dense<0.000000e+00> : vector<128x32xf32>
    %10 = tpu.matmul %7, %8, %cst_10 {dimension_numbers = #tpu.dot_dimension_numbers<[1], [0], [0], [1], [0, 0, 1, 1], [], []>} : vector<128x32xf32>, vector<32x32xf32>, vector<128x32xf32> -> vector<128x32xf32>
    %11 = vector.broadcast %9 : vector<1x32xf32> to vector<128x32xf32>
    %12 = arith.addf %10, %11 : vector<128x32xf32>
    %cst_11 = arith.constant 0.000000e+00 : f32
    %13 = vector.broadcast %cst_11 : f32 to vector<128x32xf32>
    %14 = arith.maximumf %12, %13 : vector<128x32xf32>
    %c0_12 = arith.constant 0 : index
    %c0_13 = arith.constant 0 : index
    %15 = vector.load %arg6[%c0_12, %c0_13] : memref<32x8xf32, #tpu.memory_space<vmem>>, vector<32x8xf32>
    %c0_14 = arith.constant 0 : index
    %c0_15 = arith.constant 0 : index
    %16 = vector.load %arg7[%c0_14, %c0_15] : memref<1x8xf32, #tpu.memory_space<vmem>>, vector<1x8xf32>
    %cst_16 = arith.constant dense<0.000000e+00> : vector<128x8xf32>
    %17 = tpu.matmul %14, %15, %cst_16 {dimension_numbers = #tpu.dot_dimension_numbers<[1], [0], [0], [1], [0, 0, 1, 1], [], []>} : vector<128x32xf32>, vector<32x8xf32>, vector<128x8xf32> -> vector<128x8xf32>
    %18 = vector.broadcast %16 : vector<1x8xf32> to vector<128x8xf32>
    %19 = arith.addf %17, %18 : vector<128x8xf32>
    %20 = vector.extract_strided_slice %19 {offsets = [0, 0], sizes = [8, 8], strides = [1, 1]} : vector<128x8xf32> to vector<8x8xf32>
    %21 = vector.extract_strided_slice %19 {offsets = [8, 0], sizes = [8, 8], strides = [1, 1]} : vector<128x8xf32> to vector<8x8xf32>
    %22 = vector.extract_strided_slice %19 {offsets = [16, 0], sizes = [8, 8], strides = [1, 1]} : vector<128x8xf32> to vector<8x8xf32>
    %23 = vector.extract_strided_slice %19 {offsets = [24, 0], sizes = [8, 8], strides = [1, 1]} : vector<128x8xf32> to vector<8x8xf32>
    %24 = vector.extract_strided_slice %19 {offsets = [32, 0], sizes = [8, 8], strides = [1, 1]} : vector<128x8xf32> to vector<8x8xf32>
    %25 = vector.extract_strided_slice %19 {offsets = [40, 0], sizes = [8, 8], strides = [1, 1]} : vector<128x8xf32> to vector<8x8xf32>
    %26 = vector.extract_strided_slice %19 {offsets = [48, 0], sizes = [8, 8], strides = [1, 1]} : vector<128x8xf32> to vector<8x8xf32>
    %27 = vector.extract_strided_slice %19 {offsets = [56, 0], sizes = [8, 8], strides = [1, 1]} : vector<128x8xf32> to vector<8x8xf32>
    %28 = vector.extract_strided_slice %19 {offsets = [64, 0], sizes = [8, 8], strides = [1, 1]} : vector<128x8xf32> to vector<8x8xf32>
    %29 = vector.extract_strided_slice %19 {offsets = [72, 0], sizes = [8, 8], strides = [1, 1]} : vector<128x8xf32> to vector<8x8xf32>
    %30 = vector.extract_strided_slice %19 {offsets = [80, 0], sizes = [8, 8], strides = [1, 1]} : vector<128x8xf32> to vector<8x8xf32>
    %31 = vector.extract_strided_slice %19 {offsets = [88, 0], sizes = [8, 8], strides = [1, 1]} : vector<128x8xf32> to vector<8x8xf32>
    %32 = vector.extract_strided_slice %19 {offsets = [96, 0], sizes = [8, 8], strides = [1, 1]} : vector<128x8xf32> to vector<8x8xf32>
    %33 = vector.extract_strided_slice %19 {offsets = [104, 0], sizes = [8, 8], strides = [1, 1]} : vector<128x8xf32> to vector<8x8xf32>
    %34 = vector.extract_strided_slice %19 {offsets = [112, 0], sizes = [8, 8], strides = [1, 1]} : vector<128x8xf32> to vector<8x8xf32>
    %35 = vector.extract_strided_slice %19 {offsets = [120, 0], sizes = [8, 8], strides = [1, 1]} : vector<128x8xf32> to vector<8x8xf32>
    %36 = tpu.concatenate %20, %21, %22, %23, %24, %25, %26, %27, %28, %29, %30, %31, %32, %33, %34, %35 in 1 : vector<8x8xf32>, vector<8x8xf32>, vector<8x8xf32>, vector<8x8xf32>, vector<8x8xf32>, vector<8x8xf32>, vector<8x8xf32>, vector<8x8xf32>, vector<8x8xf32>, vector<8x8xf32>, vector<8x8xf32>, vector<8x8xf32>, vector<8x8xf32>, vector<8x8xf32>, vector<8x8xf32>, vector<8x8xf32> -> vector<8x128xf32>
    %c0_17 = arith.constant 0 : index
    %c0_18 = arith.constant 0 : index
    %37 = vector.load %arg8[%c0_17, %c0_18] : memref<8x128xf32, #tpu.memory_space<vmem>>, vector<8x128xf32>
    tpu.vector_store %arg8[%c0_17, %c0_18], %36 {strides = array<i32>} : memref<8x128xf32, #tpu.memory_space<vmem>>, vector<8x128xf32>,
    return
  }
  func.func @transform_0(%arg0: i32) -> (i32, i32) {
    %c0_i32 = arith.constant 0 : i32
    %c0_i32_0 = arith.constant 0 : i32
    return %arg0, %c0_i32 : i32, i32
  }
  func.func @transform_1(%arg0: i32) -> (i32, i32) {
    %c0_i32 = arith.constant 0 : i32
    %c0_i32_0 = arith.constant 0 : i32
    %c0_i32_1 = arith.constant 0 : i32
    return %c0_i32, %c0_i32_0 : i32, i32
  }
  func.func @transform_2(%arg0: i32) -> (i32, i32) {
    %c0_i32 = arith.constant 0 : i32
    %c0_i32_0 = arith.constant 0 : i32
    %c0_i32_1 = arith.constant 0 : i32
    return %c0_i32, %c0_i32_0 : i32, i32
  }
  func.func @transform_3(%arg0: i32) -> (i32, i32) {
    %c0_i32 = arith.constant 0 : i32
    %c0_i32_0 = arith.constant 0 : i32
    %c0_i32_1 = arith.constant 0 : i32
    return %c0_i32, %c0_i32_0 : i32, i32
  }
  func.func @transform_4(%arg0: i32) -> (i32, i32) {
    %c0_i32 = arith.constant 0 : i32
    %c0_i32_0 = arith.constant 0 : i32
    %c0_i32_1 = arith.constant 0 : i32
    return %c0_i32, %c0_i32_0 : i32, i32
  }
  func.func @transform_5(%arg0: i32) -> (i32, i32) {
    %c0_i32 = arith.constant 0 : i32
    %c0_i32_0 = arith.constant 0 : i32
    %c0_i32_1 = arith.constant 0 : i32
    return %c0_i32, %c0_i32_0 : i32, i32
  }
  func.func @transform_6(%arg0: i32) -> (i32, i32) {
    %c0_i32 = arith.constant 0 : i32
    %c0_i32_0 = arith.constant 0 : i32
    %c0_i32_1 = arith.constant 0 : i32
    return %c0_i32, %c0_i32_0 : i32, i32
  }
  func.func @transform_7(%arg0: i32) -> (i32, i32) {
    %c0_i32 = arith.constant 0 : i32
    %c0_i32_0 = arith.constant 0 : i32
    return %arg0, %c0_i32 : i32, i32
  }
}

</mosaic_0001>

<bundles_post_ra>
// kernel: tpu_custom_call.1
= control target key start
LH: loop header
LB: loop body
LE: loop exit
PB: predicated region body
PF: predicated region fallthrough
CT: control target
= control target key end

     0   :  { %vm54_vm0 = vcmask 261120   ;;  %s1280_s0 = inlined_call_operand.vmem [shape: f32[128,32], index: 0, kind: input, shape index: {}]   ;;  %s1281_s1 = inlined_call_operand.vmem [shape: f32[32,32], index: 1, kind: input, shape index: {}]   ;;  %s1282_s2 = inlined_call_operand.vmem [shape: f32[1,32], index: 2, kind: input, shape index: {}]   ;;  %s1283_s3 = inlined_call_operand.vmem [shape: f32[32,32], index: 3, kind: input, shape index: {}]   ;;  %s1284_s4 = inlined_call_operand.vmem [shape: f32[1,32], index: 4, kind: input, shape index: {}]   ;;  %s1285_s5 = inlined_call_operand.vmem [shape: f32[32,8], index: 5, kind: input, shape index: {}]   ;;  %s1286_s6 = inlined_call_operand.vmem [shape: f32[1,8], index: 6, kind: input, shape index: {}]   ;;  %s1287_s7 = inlined_call_operand.hbm [shape: f32[8,128], index: 7, kind: output, shape index: {}]  }
   0x1   :  { %v43_v0 = vld [vmem:[%s1281_s1] sm:$0xff]  ;;  %v44_v1 = vld [vmem:[%s1281_s1 + $0x8] sm:$0xff]  ;;  %v45_v2 = vld [vmem:[%s1281_s1 + $0x10] sm:$0xff] }
   0x2   :  { %v999_v3 = vpack.c.bf16 %v44_v1, %v43_v0  ;;  %v46_v4 = vld [vmem:[%s1281_s1 + $0x18] sm:$0xff]  ;;  %v27_v5 = vld [vmem:[%s1280_s0] sm:$0xff]  ;;  %v265_v9 = vld [vmem:[%s1283_s3 + $0x8] sm:$0xff] }
   0x3   :  { %v1003_v6 = vpack.c.bf16 %v46_v4, %v45_v2  ;;  %911 = vmatprep.mubr.msk.f32.mxu0 %vm54_vm0, %v27_v5  ;;  %v35_v7 = vld [vmem:[%s1280_s0 + $0x40] sm:$0xff]  ;;  %v266_v10 = vld [vmem:[%s1283_s3 + $0x10] sm:$0xff]  ;;  %v267_v11 = vld [vmem:[%s1283_s3 + $0x18] sm:$0xff] }
   0x4   :  { %1000 = vmatprep.subr.bf16.mxu0 %v999_v3  ;;  %1023 = vmatprep.subr.bf16.mxu1 %v999_v3  ;;  %v264_v8 = vld [vmem:[%s1283_s3] sm:$0xff]  ;;  %v28_v12 = vld [vmem:[%s1280_s0 + $0x8] sm:$0xff] }
   0x5   :  { %1002 = vmatpush3.bf16.msra.mxu0 %v999_v3  ;;  %1025 = vmatpush3.bf16.msra.mxu1 %v999_v3  ;;  %v36_v13 = vld [vmem:[%s1280_s0 + $0x48] sm:$0xff]  ;;  %v1007_v14 = vpack.c.bf16 %v265_v9, %v264_v8 }
   0x6   :  { %1004 = vmatprep.subr.bf16.mxu0 %v1003_v6  ;;  %1024 = vmatprep.subr.bf16.mxu1 %v1003_v6 }
   0x7   :  { %923 = vmatprep.mubr.msk.f32.mxu1 %vm54_vm0, %v35_v7 }
   0x9   :  { %1006 = vmatpush3.bf16.msra.mxu0 %v1003_v6  ;;  %1026 = vmatpush3.bf16.msra.mxu1 %v1003_v6 }
   0xa   :  { %12 = vsyncpa [#allocation3], 0  ;;  %v29_v15 = vld [vmem:[%s1280_s0 + $0x10] sm:$0xff]  ;;  %1008 = vmatprep.subr.bf16.mxu1 %v1007_v14  ;;  %v1011_v17 = vpack.c.bf16 %v267_v11, %v266_v10  ;;  %v30_v18 = vld [vmem:[%s1280_s0 + $0x18] sm:$0xff]  ;;  %s1067_s9 = smov 8   ;;  %s1068_s10 = smov 24  }
   0xb   :  { %v37_v16 = vld [vmem:[%s1280_s0 + $0x50] sm:$0xff]  ;;  %v38_v19 = vld [vmem:[%s1280_s0 + $0x58] sm:$0xff]  ;;  %v31_v20 = vld [vmem:[%s1280_s0 + $0x20] sm:$0xff]  ;;  %s1069_s11 = smov 16   ;;  %s1071_s12 = smov 40   ;;  %vm748_vm1 = vcmask 64512  }
   0xc   :  { %912 = vmatmul.mubr.msk.f32.vlgmr.msra.gmra.mrb[0].mxu0 %vm54_vm0, %v28_v12  ;;  %924 = vmatmul.mubr.msk.f32.vlgmr.msra.gmra.mrb[0].mxu1 %vm54_vm0, %v36_v13  ;;  %v39_v21 = vld [vmem:[%s1280_s0 + $0x60] sm:$0xff]  ;;  %v32_v22 = vld [vmem:[%s1280_s0 + $0x28] sm:$0xff]  ;;  %v33_v24 = vld [vmem:[%s1280_s0 + $0x30] sm:$0xff]  ;;  %s1072_s1 = smov 48   ;;  %s1073_s13 = smov 56   ;;  %vm750_vm2 = vcmask 130048  }
   0xd   :  { %914 = vmatprep.mubr.msk.f32.mxu0 %vm54_vm0, %v29_v15  ;;  %926 = vmatprep.mubr.msk.f32.mxu1 %vm54_vm0, %v37_v16  ;;  %v40_v23 = vld [vmem:[%s1280_s0 + $0x68] sm:$0xff]  ;;  %v41_v25 = vld [vmem:[%s1280_s0 + $0x70] sm:$0xff]  ;;  %v34_v26 = vld [vmem:[%s1280_s0 + $0x38] sm:$0xff]  ;;  %s1074_s14 = smov 64   ;;  %s1075_s15 = smov 72   ;;  %vm752_vm3 = vcmask 195584  }
   0xe   :  { %1010 = vmatpush3.bf16.msra.mxu1 %v1007_v14  ;;  %v42_v27 = vld [vmem:[%s1280_s0 + $0x78] sm:$0xff]  ;;  %v484_v28 = vld [vmem:[%s1285_s5] sm:$0xff]  ;;  %v485_v29 = vld [vmem:[%s1285_s5 + $0x8] sm:$0xff]  ;;  %s1076_s16 = smov 80   ;;  %s1077_s17 = smov 88   ;;  %vm755_vm4 = vcmask 326656  }
   0xf   :  { %1012 = vmatprep.subr.bf16.mxu1 %v1011_v17  ;;  %v486_v30 = vld [vmem:[%s1285_s5 + $0x10] sm:$0xff]  ;;  %v1015_v31 = vpack.c.bf16 %v485_v29, %v484_v28  ;;  %v487_v32 = vld [vmem:[%s1285_s5 + $0x18] sm:$0xff]  ;;  %v792_v34 = vld [vmem:[%s1282_s2] ss:$0 sm:$0xff]  ;;  %s1078_s18 = smov 96   ;;  %s1079_s19 = smov 104  }
  0x10   :  { %915 = vmatmul.mubr.msk.f32.gmra.mrb[2].mxu0 %vm54_vm0, %v30_v18  ;;  %927 = vmatmul.mubr.msk.f32.gmra.mrb[2].mxu1 %vm54_vm0, %v38_v19  ;;  %v1019_v33 = vpack.c.bf16 %v487_v32, %v486_v30  ;;  %v809_v19 = vld [vmem:[%s1284_s4] ss:$0 sm:$0xff]  ;;  %s1080_s20 = smov 112   ;;  %s1081_s21 = smov 120   ;;  %vm757_vm5 = vcmask 392192   ;;  %vm759_vm6 = vcmask 457728  }
  0x11   :  { %917 = vmatprep.mubr.msk.f32.mxu0 %vm54_vm0, %v31_v20  ;;  %929 = vmatprep.mubr.msk.f32.mxu1 %vm54_vm0, %v39_v21  ;;  %vm761_vm7 = vcmask 523264   ;;  %vm763_vm8 = vcmask 588800   ;;  %vm765_vm9 = vcmask 654336   ;;  %vm767_vm10 = vcmask 719872   ;;  %s1082_s22 = smov [#allocation2]  }
  0x12   :  { %1014 = vmatpush3.bf16.msra.mxu1 %v1011_v17  ;;  %1016 = vmatprep.subr.bf16.mxu0 %v1015_v31  ;;  %vm769_vm11 = vcmask 785408   ;;  %vm771_vm12 = vcmask 850944   ;;  %vm773_vm13 = vcmask 916480   ;;  %s784_s23 = sshll.u32 %s1082_s22, 4  ;;  %vm775_vm14 = vcmask 982016   ;;  %s785_s23 = int_to_ptr.vmem [resolvable:$true] %s784_s23 }
  0x13   :  { %1018 = vmatpush3.bf16.msra.mxu0 %v1015_v31  ;;  %s1043_s24 = scalar_lea.vmem %s785_s23, 128  ;;  %p1048_p1 = scmp.lt.s32.totalorder %s785_s23, %s785_s23 }
  0x14   :  { %918 = vmatmul.mubr.msk.f32.gmra.mrb[4].mxu0 %vm54_vm0, %v32_v22  ;;  %930 = vmatmul.mubr.msk.f32.gmra.mrb[4].mxu1 %vm54_vm0, %v40_v23  ;;  %p1044_p0 = scmp.ne.s32.totalorder %s785_s23, %s1043_s24  ;;  %p1049_p2 = scmp.lt.s32.totalorder %s1043_s24, %s1043_s24 }
  0x15   :  { %920 = vmatprep.mubr.msk.f32.mxu0 %vm54_vm0, %v33_v24  ;;  %932 = vmatprep.mubr.msk.f32.mxu1 %vm54_vm0, %v41_v25 }
  0x16   :  { %1020 = vmatprep.subr.bf16.mxu0 %v1019_v33  ;;  %p1050_p3 = por %p1049_p2, %p1048_p1 }
  0x17   :  { %1022 = vmatpush3.bf16.msra.mxu0 %v1019_v33 }
  0x18   :  { %921 = vmatmul.mubr.msk.f32.gmra.mrb[6].mxu0 %vm54_vm0, %v34_v26  ;;  %933 = vmatmul.mubr.msk.f32.gmra.mrb[6].mxu1 %vm54_vm0, %v42_v27  ;;  %p1051_p4 = pnand %p1050_p3, %p1044_p0 }
  0xdf   :  { %v913_v35 = vpop.f32.mrb[0].mxu0  ;;  %v925_v36 = vpop.f32.mrb[0].mxu1 }
  0xe0   :  { %v175_v37 = vadd.f32 %v913_v35, %v792_v34  ;;  %v169_v38 = vpop.f32.mrb[1].mxu0  ;;  %v209_v39 = vpop.f32.mrb[1].mxu1  ;;  %v215_v6 = vadd.f32 %v925_v36, %v792_v34 }
  0xe1   :  { %v170_v40 = vadd.f32 %v792_v34, %v169_v38  ;;  %v210_v59 = vadd.f32 %v792_v34, %v209_v39 }
  0xe2   :  { %v249_v44 = vmax.f32 %v175_v37, 0.0  ;;  %v257_v9 = vmax.f32 %v215_v6, 0.0 }
  0xe3   :  { %v248_v41 = vmax.f32 %v170_v40, 0.0  ;;  %v916_v42 = vpop.f32.mrb[2].mxu0  ;;  %v928_v43 = vpop.f32.mrb[2].mxu1  ;;  %v256_v3 = vmax.f32 %v210_v59, 0.0 }
  0xe4   :  { %v185_v45 = vadd.f32 %v916_v42, %v792_v34  ;;  %v179_v46 = vpop.f32.mrb[3].mxu0  ;;  %v219_v47 = vpop.f32.mrb[3].mxu1  ;;  %v225_v10 = vadd.f32 %v928_v43, %v792_v34 }
  0xe5   :  { %v180_v48 = vadd.f32 %v792_v34, %v179_v46  ;;  %943 = vmatprep.mubr.msk.f32.mxu1 %vm54_vm0, %v248_v41  ;;  %v220_v4 = vadd.f32 %v792_v34, %v219_v47 }
  0xe6   :  { %944 = vmatmul.mubr.msk.f32.vlgmr.msra.gmra.mrb[8].mxu1 %vm54_vm0, %v249_v44  ;;  %v251_v52 = vmax.f32 %v185_v45, 0.0  ;;  %v259_v13 = vmax.f32 %v225_v10, 0.0 }
  0xe7   :  { %v250_v49 = vmax.f32 %v180_v48, 0.0  ;;  %v919_v50 = vpop.f32.mrb[4].mxu0  ;;  %v931_v51 = vpop.f32.mrb[4].mxu1  ;;  %v258_v7 = vmax.f32 %v220_v4, 0.0  ;;  %v826_v4 = vld [vmem:[%s1286_s6] ss:$0 sm:$0xff] }
  0xe8   :  { %v195_v53 = vadd.f32 %v919_v50, %v792_v34  ;;  %v189_v54 = vpop.f32.mrb[5].mxu0  ;;  %v229_v55 = vpop.f32.mrb[5].mxu1  ;;  %v235_v14 = vadd.f32 %v931_v51, %v792_v34  ;;  %s1070_s6 = smov 32  }
  0xe9   :  { %v190_v56 = vadd.f32 %v792_v34, %v189_v54  ;;  %946 = vmatprep.mubr.msk.f32.mxu1 %vm54_vm0, %v250_v49  ;;  %v230_v8 = vadd.f32 %v792_v34, %v229_v55 }
  0xea   :  { %947 = vmatmul.mubr.msk.f32.gmra.mrb[10].mxu1 %vm54_vm0, %v251_v52  ;;  %v253_v61 = vmax.f32 %v195_v53, 0.0  ;;  %v261_v16 = vmax.f32 %v235_v14, 0.0 }
  0xeb   :  { %v252_v57 = vmax.f32 %v190_v56, 0.0  ;;  %v922_v58 = vpop.f32.mrb[6].mxu0  ;;  %v934_v60 = vpop.f32.mrb[6].mxu1  ;;  %v260_v11 = vmax.f32 %v230_v8, 0.0 }
  0xec   :  { %v205_v62 = vadd.f32 %v922_v58, %v792_v34  ;;  %v199_v63 = vpop.f32.mrb[7].mxu0  ;;  %v239_v0 = vpop.f32.mrb[7].mxu1  ;;  %v245_v17 = vadd.f32 %v934_v60, %v792_v34 }
  0xed   :  { %v200_v1 = vadd.f32 %v792_v34, %v199_v63  ;;  %949 = vmatprep.mubr.msk.f32.mxu1 %vm54_vm0, %v252_v57  ;;  %v240_v12 = vadd.f32 %v792_v34, %v239_v0 }
  0xee   :  { %950 = vmatmul.mubr.msk.f32.gmra.mrb[12].mxu1 %vm54_vm0, %v253_v61  ;;  %v255_v5 = vmax.f32 %v205_v62, 0.0  ;;  %v263_v18 = vmax.f32 %v245_v17, 0.0 }
  0xef   :  { %v254_v2 = vmax.f32 %v200_v1, 0.0  ;;  %v262_v15 = vmax.f32 %v240_v12, 0.0 }
  0xf1   :  { %952 = vmatprep.mubr.msk.f32.mxu1 %vm54_vm0, %v254_v2 }
  0xf2   :  { %953 = vmatmul.mubr.msk.f32.gmra.mrb[14].mxu1 %vm54_vm0, %v255_v5 }
  0xf3   :  { %955 = vmatprep.mubr.msk.f32.mxu1 %vm54_vm0, %v256_v3 }
  0xf6   :  { %956 = vmatmul.mubr.msk.f32.gmra.mrb[16].mxu1 %vm54_vm0, %v257_v9 }
  0xf7   :  { %958 = vmatprep.mubr.msk.f32.mxu1 %vm54_vm0, %v258_v7 }
  0xfa   :  { %959 = vmatmul.mubr.msk.f32.gmra.mrb[18].mxu1 %vm54_vm0, %v259_v13 }
  0xfb   :  { %961 = vmatprep.mubr.msk.f32.mxu1 %vm54_vm0, %v260_v11 }
  0xfe   :  { %962 = vmatmul.mubr.msk.f32.gmra.mrb[20].mxu1 %vm54_vm0, %v261_v16 }
  0xff   :  { %964 = vmatprep.mubr.msk.f32.mxu1 %vm54_vm0, %v262_v15 }
 0x102   :  { %965 = vmatmul.mubr.msk.f32.gmra.mrb[22].mxu1 %vm54_vm0, %v263_v18 }
 0x1b9   :  { %v945_v20 = vpop.f32.mrb[8].mxu1 }
 0x1ba   :  { %v395_v21 = vadd.f32 %v945_v20, %v809_v19  ;;  %v389_v22 = vpop.f32.mrb[9].mxu1 }
 0x1bb   :  { %v390_v23 = vadd.f32 %v809_v19, %v389_v22 }
 0x1bc   :  { %v469_v26 = vmax.f32 %v395_v21, 0.0 }
 0x1bd   :  { %v468_v24 = vmax.f32 %v390_v23, 0.0  ;;  %v948_v25 = vpop.f32.mrb[10].mxu1 }
 0x1be   :  { %v405_v27 = vadd.f32 %v948_v25, %v809_v19  ;;  %v399_v28 = vpop.f32.mrb[11].mxu1 }
 0x1bf   :  { %v400_v29 = vadd.f32 %v809_v19, %v399_v28  ;;  %975 = vmatprep.mubr.msk.f32.mxu0 %vm54_vm0, %v468_v24 }
 0x1c0   :  { %976 = vmatmul.mubr.msk.f32.vlgmr.msra.gmra.mrb[8].mxu0 %vm54_vm0, %v469_v26  ;;  %v471_v32 = vmax.f32 %v405_v27, 0.0 }
 0x1c1   :  { %v470_v30 = vmax.f32 %v400_v29, 0.0  ;;  %v951_v31 = vpop.f32.mrb[12].mxu1 }
 0x1c2   :  { %v415_v33 = vadd.f32 %v951_v31, %v809_v19  ;;  %v409_v34 = vpop.f32.mrb[13].mxu1 }
 0x1c3   :  { %v410_v35 = vadd.f32 %v809_v19, %v409_v34  ;;  %978 = vmatprep.mubr.msk.f32.mxu0 %vm54_vm0, %v470_v30 }
 0x1c4   :  { %979 = vmatmul.mubr.msk.f32.gmra.mrb[10].mxu0 %vm54_vm0, %v471_v32  ;;  %v473_v38 = vmax.f32 %v415_v33, 0.0 }
 0x1c5   :  { %v472_v36 = vmax.f32 %v410_v35, 0.0  ;;  %v954_v37 = vpop.f32.mrb[14].mxu1 }
 0x1c6   :  { %v425_v39 = vadd.f32 %v954_v37, %v809_v19  ;;  %v419_v40 = vpop.f32.mrb[15].mxu1 }
 0x1c7   :  { %v420_v41 = vadd.f32 %v809_v19, %v419_v40  ;;  %981 = vmatprep.mubr.msk.f32.mxu0 %vm54_vm0, %v472_v36 }
 0x1c8   :  { %982 = vmatmul.mubr.msk.f32.gmra.mrb[12].mxu0 %vm54_vm0, %v473_v38  ;;  %v475_v44 = vmax.f32 %v425_v39, 0.0 }
 0x1c9   :  { %v474_v42 = vmax.f32 %v420_v41, 0.0  ;;  %v957_v43 = vpop.f32.mrb[16].mxu1 }
 0x1ca   :  { %v435_v45 = vadd.f32 %v957_v43, %v809_v19  ;;  %v429_v46 = vpop.f32.mrb[17].mxu1 }
 0x1cb   :  { %v430_v47 = vadd.f32 %v809_v19, %v429_v46  ;;  %984 = vmatprep.mubr.msk.f32.mxu0 %vm54_vm0, %v474_v42 }
 0x1cc   :  { %985 = vmatmul.mubr.msk.f32.gmra.mrb[14].mxu0 %vm54_vm0, %v475_v44  ;;  %v477_v50 = vmax.f32 %v435_v45, 0.0 }
 0x1cd   :  { %v476_v48 = vmax.f32 %v430_v47, 0.0  ;;  %v960_v49 = vpop.f32.mrb[18].mxu1 }
 0x1ce   :  { %v445_v51 = vadd.f32 %v960_v49, %v809_v19  ;;  %v439_v52 = vpop.f32.mrb[19].mxu1 }
 0x1cf   :  { %v440_v53 = vadd.f32 %v809_v19, %v439_v52  ;;  %987 = vmatprep.mubr.msk.f32.mxu0 %vm54_vm0, %v476_v48 }
 0x1d0   :  { %988 = vmatmul.mubr.msk.f32.gmra.mrb[16].mxu0 %vm54_vm0, %v477_v50  ;;  %v479_v56 = vmax.f32 %v445_v51, 0.0 }
 0x1d1   :  { %v478_v54 = vmax.f32 %v440_v53, 0.0  ;;  %v963_v55 = vpop.f32.mrb[20].mxu1 }
 0x1d2   :  { %v455_v57 = vadd.f32 %v963_v55, %v809_v19  ;;  %v449_v58 = vpop.f32.mrb[21].mxu1 }
 0x1d3   :  { %v450_v59 = vadd.f32 %v809_v19, %v449_v58  ;;  %990 = vmatprep.mubr.msk.f32.mxu0 %vm54_vm0, %v478_v54 }
 0x1d4   :  { %991 = vmatmul.mubr.msk.f32.gmra.mrb[18].mxu0 %vm54_vm0, %v479_v56  ;;  %v481_v62 = vmax.f32 %v455_v57, 0.0 }
 0x1d5   :  { %v480_v60 = vmax.f32 %v450_v59, 0.0  ;;  %v966_v61 = vpop.f32.mrb[22].mxu1 }
 0x1d6   :  { %v465_v63 = vadd.f32 %v966_v61, %v809_v19  ;;  %v459_v0 = vpop.f32.mrb[23].mxu1 }
 0x1d7   :  { %v460_v1 = vadd.f32 %v809_v19, %v459_v0  ;;  %993 = vmatprep.mubr.msk.f32.mxu0 %vm54_vm0, %v480_v60 }
 0x1d8   :  { %994 = vmatmul.mubr.msk.f32.gmra.mrb[20].mxu0 %vm54_vm0, %v481_v62  ;;  %v483_v3 = vmax.f32 %v465_v63, 0.0 }
 0x1d9   :  { %v482_v2 = vmax.f32 %v460_v1, 0.0 }
 0x1db   :  { %996 = vmatprep.mubr.msk.f32.mxu0 %vm54_vm0, %v482_v2 }
 0x1dc   :  { %997 = vmatmul.mubr.msk.f32.gmra.mrb[22].mxu0 %vm54_vm0, %v483_v3 }
 0x293   :  { %v977_v5 = vpop.f32.mrb[8].mxu0 }
 0x294   :  { %v615_v6 = vadd.f32 %v977_v5, %v826_v4  ;;  %v609_v7 = vpop.f32.mrb[9].mxu0 }
 0x295   :  { %v1264_v8 = vadd.f32 %v826_v4, %v609_v7 }
 0x296   :  { %689 = vrot.lane.b32.xlu0 %v615_v6, %s1067_s9 }
 0x297   :  { %v980_v9 = vpop.f32.mrb[10].mxu0 }
 0x298   :  { %v625_v10 = vadd.f32 %v980_v9, %v826_v4  ;;  %v619_v11 = vpop.f32.mrb[11].mxu0 }
 0x299   :  { %v620_v12 = vadd.f32 %v826_v4, %v619_v11 }
 0x29a   :  { %697 = vrot.lane.b32.xlu1 %v625_v10, %s1068_s10 }
 0x29b   :  { %v983_v13 = vpop.f32.mrb[12].mxu0  ;;  %693 = vrot.lane.b32.xlu0 %v620_v12, %s1069_s11 }
 0x29c   :  { %v635_v14 = vadd.f32 %v983_v13, %v826_v4  ;;  %v629_v15 = vpop.f32.mrb[13].mxu0 }
 0x29d   :  { %v630_v16 = vadd.f32 %v826_v4, %v629_v15 }
 0x29f   :  { %v986_v17 = vpop.f32.mrb[14].mxu0  ;;  %701 = vrot.lane.b32.xlu1 %v630_v16, %s1070_s6  ;;  %705 = vrot.lane.b32.xlu0 %v635_v14, %s1071_s12 }
 0x2a0   :  { %v645_v18 = vadd.f32 %v986_v17, %v826_v4  ;;  %v639_v19 = vpop.f32.mrb[15].mxu0 }
 0x2a1   :  { %v640_v20 = vadd.f32 %v826_v4, %v639_v19 }
 0x2a3   :  { %v989_v21 = vpop.f32.mrb[16].mxu0  ;;  %709 = vrot.lane.b32.xlu1 %v640_v20, %s1072_s1  ;;  %713 = vrot.lane.b32.xlu0 %v645_v18, %s1073_s13 }
 0x2a4   :  { %v655_v22 = vadd.f32 %v989_v21, %v826_v4  ;;  %v649_v23 = vpop.f32.mrb[17].mxu0 }
 0x2a5   :  { %v650_v24 = vadd.f32 %v826_v4, %v649_v23 }
 0x2a7   :  { %v992_v25 = vpop.f32.mrb[18].mxu0  ;;  %717 = vrot.lane.b32.xlu1 %v650_v24, %s1074_s14  ;;  %721 = vrot.lane.b32.xlu0 %v655_v22, %s1075_s15 }
 0x2a8   :  { %v665_v26 = vadd.f32 %v992_v25, %v826_v4  ;;  %v659_v27 = vpop.f32.mrb[19].mxu0 }
 0x2a9   :  { %v660_v28 = vadd.f32 %v826_v4, %v659_v27 }
 0x2ab   :  { %v995_v29 = vpop.f32.mrb[20].mxu0  ;;  %725 = vrot.lane.b32.xlu1 %v660_v28, %s1076_s16  ;;  %729 = vrot.lane.b32.xlu0 %v665_v26, %s1077_s17 }
 0x2ac   :  { %v675_v30 = vadd.f32 %v995_v29, %v826_v4  ;;  %v669_v31 = vpop.f32.mrb[21].mxu0 }
 0x2ad   :  { %v670_v32 = vadd.f32 %v826_v4, %v669_v31 }
 0x2af   :  { %v998_v33 = vpop.f32.mrb[22].mxu0  ;;  %733 = vrot.lane.b32.xlu1 %v670_v32, %s1078_s18  ;;  %737 = vrot.lane.b32.xlu0 %v675_v30, %s1079_s19 }
 0x2b0   :  { %v685_v34 = vadd.f32 %v998_v33, %v826_v4  ;;  %v679_v35 = vpop.f32.mrb[23].mxu0 }
 0x2b1   :  { %v680_v36 = vadd.f32 %v826_v4, %v679_v35 }
 0x2b3   :  { %741 = vrot.lane.b32.xlu1 %v680_v36, %s1080_s20  ;;  %745 = vrot.lane.b32.xlu0 %v685_v34, %s1081_s21 }
 0x308   :  { %v690_v37 = vpop.permute.xlu0 %689 }
 0x309   :  { %v749_v39 = vsel %vm748_vm1, %v1264_v8, %v690_v37 }
 0x30c   :  { %v698_v38 = vpop.permute.xlu1 %697 }
 0x30d   :  { %v694_v40 = vpop.permute.xlu0 %693 }
 0x30e   :  { %v751_v41 = vsel %vm750_vm2, %v749_v39, %v694_v40 }
 0x30f   :  { %v753_v43 = vsel %vm752_vm3, %v751_v41, %v698_v38 }
 0x311   :  { %v702_v42 = vpop.permute.xlu1 %701  ;;  %v706_v44 = vpop.permute.xlu0 %705 }
 0x312   :  { %v754_v45 = vsel %vm54_vm0, %v753_v43, %v702_v42 }
 0x313   :  { %v756_v46 = vsel %vm755_vm4, %v754_v45, %v706_v44 }
 0x315   :  { %v710_v47 = vpop.permute.xlu1 %709  ;;  %v714_v48 = vpop.permute.xlu0 %713 }
 0x316   :  { %v758_v49 = vsel %vm757_vm5, %v756_v46, %v710_v47 }
 0x317   :  { %v760_v50 = vsel %vm759_vm6, %v758_v49, %v714_v48 }
 0x319   :  { %v718_v51 = vpop.permute.xlu1 %717  ;;  %v722_v52 = vpop.permute.xlu0 %721 }
 0x31a   :  { %v762_v53 = vsel %vm761_vm7, %v760_v50, %v718_v51 }
 0x31b   :  { %v764_v54 = vsel %vm763_vm8, %v762_v53, %v722_v52 }
 0x31d   :  { %v726_v55 = vpop.permute.xlu1 %725  ;;  %v730_v56 = vpop.permute.xlu0 %729 }
 0x31e   :  { %v766_v57 = vsel %vm765_vm9, %v764_v54, %v726_v55 }
 0x31f   :  { %v768_v58 = vsel %vm767_vm10, %v766_v57, %v730_v56 }
 0x321   :  { %v734_v59 = vpop.permute.xlu1 %733  ;;  %v738_v60 = vpop.permute.xlu0 %737 }
 0x322   :  { %v770_v61 = vsel %vm769_vm11, %v768_v58, %v734_v59 }
 0x323   :  { %v772_v62 = vsel %vm771_vm12, %v770_v61, %v738_v60 }
 0x325   :  { %v742_v63 = vpop.permute.xlu1 %741  ;;  %v746_v0 = vpop.permute.xlu0 %745 }
 0x326   :  { %v774_v1 = vsel %vm773_vm13, %v772_v62, %v742_v63 }
 0x327   :  { %v776_v2 = vsel %vm775_vm14, %v774_v1, %v746_v0 }
 0x328   :  { %777 = vst [vmem:[#allocation2] sm:$0xff] %v776_v2 }
 0x329   :  { %1054 = shalt.err (!%p1051_p4)
}
 0x32a   :  { %s1055_s27 = scalar_lea.hbm %s1287_s7, 128 }
 0x32b   :  { %p1056_p5 = scmp.ne.s32.totalorder %s1287_s7, %s1055_s27  ;;  %p1059_p6 = scmp.lt.u32.totalorder %s1055_s27, %s1287_s7 }
 0x32d   :  { %p1061_p7 = pnand %p1059_p6, %p1056_p5 }
 0x32f   :  { %1064 = shalt.err (!%p1061_p7)
}
 0x330   :  { %787 = dma.vmem_to_hbm [thread:$0]  %s785_s23, 128, %s1287_s7, [#allocation3]  }
 0x331   :  { %1065 = dma.done.wait [#allocation3], 128  }
 0x332   :  { %1066 = vsyncadd [#allocation3], 4294967168 }
 0x333   :  { %791 = vsyncpa [#allocation3], 1 }

</bundles_post_ra>
